<compile_context>
chip_gen: v6e
topology: v6e:2x2x1
jax: 0.10.0
libtpu: 0.0.40
codegen_flags: <defaults>
</compile_context>

<pallas_src>
import jax
import jax.numpy as jnp
from jax.experimental import pallas as pl
from jax.experimental.pallas import tpu as pltpu


def _policy_act_kernel(obs_ref, w1_ref, b1_ref, wh_ref, bh_ref,
                       action_ref, vl_ref):
    obs = obs_ref[...]                                          # (TB, OBS) f32

    # --- net: features = relu(obs @ W1 + b1) ---
    feat = jnp.dot(obs, w1_ref[...], preferred_element_type=jnp.float32)
    feat = jnp.maximum(feat + b1_ref[...], 0.0)                 # (TB, HID)

    # --- fused actor+critic head: [logits | value] = feat @ [Wa|Wc] + [ba|bc] ---
    head = jnp.dot(feat, wh_ref[...], preferred_element_type=jnp.float32)
    head = head + bh_ref[...]                                   # (TB, ACT+1)
    n_act = head.shape[-1] - 1
    logits = head[:, :n_act]                                    # (TB, ACT)
    value = head[:, n_act:]                                     # (TB, 1)

    # --- numerically stable log-softmax pieces ---
    m = jnp.max(logits, axis=-1, keepdims=True)
    shifted = logits - m
    lse = jnp.log(jnp.sum(jnp.exp(shifted), axis=-1, keepdims=True))  # (TB, 1)

    # --- deterministic action = argmax (first maximal index, torch-compatible) ---
    ids = jax.lax.broadcasted_iota(jnp.int32, logits.shape, 1)
    is_max = logits >= m
    action = jnp.min(jnp.where(is_max, ids, n_act), axis=-1, keepdims=True)
    action_ref[...] = action.astype(jnp.int32)                  # (TB, 1) i32

    # --- log_prob(argmax) == -lse exactly (shifted at argmax is 0) ---
    # pack [value, log_prob] into one lane-denser f32 store
    vl_ref[...] = jnp.concatenate([value, -lse], axis=-1)       # (TB, 2)


def policy_act(obs, rnn_hidden_states, params, *, tile_b=None):
    """Deterministic Policy.act.

    Returns (value, action, action_log_probs, rnn_hidden_states).
    """
    w1, b1, wa, ba, wc, bc = params
    B, obs_dim = obs.shape
    hid = w1.shape[1]
    n_act = wa.shape[1]

    # Fuse actor + critic into one (HID, ACT+1) head (done once in the wrapper).
    w_head = jnp.concatenate([wa, wc], axis=1)       # (HID, ACT+1)
    b_head = jnp.concatenate([ba, bc], axis=1)       # (1, ACT+1)

    if tile_b is None:
        # Keep tiles well under the v7x scoped-VMEM budget (32 MiB) even with
        # double-buffered inputs/outputs; at f32 a 512-row tile of a few
        # hundred features is << 1 MiB.
        tile_b = min(B, 512)

    grid = (pl.cdiv(B, tile_b),)

    const = lambda i: (0, 0)          # weights/biases stay VMEM-resident
    batched = lambda i: (i, 0)        # batch-tiled arrays

    action, value_logp = pl.pallas_call(
        _policy_act_kernel,
        out_shape=(
            jax.ShapeDtypeStruct((B, 1), jnp.int32),      # action
            jax.ShapeDtypeStruct((B, 2), jnp.float32),    # [value, log_prob]
        ),
        grid=grid,
        in_specs=[
            pl.BlockSpec((tile_b, obs_dim), batched),     # obs
            pl.BlockSpec((obs_dim, hid), const),          # W1
            pl.BlockSpec((1, hid), const),                # b1
            pl.BlockSpec((hid, n_act + 1), const),        # [Wa | Wc]
            pl.BlockSpec((1, n_act + 1), const),          # [ba | bc]
        ],
        out_specs=(
            pl.BlockSpec((tile_b, 1), batched),
            pl.BlockSpec((tile_b, 2), batched),
        ),
        compiler_params=pltpu.CompilerParams(
            dimension_semantics=("parallel",),
            vmem_limit_bytes=32 * 1024 * 1024,
        ),
    )(obs, w1, b1, w_head, b_head)

    value = value_logp[:, 0:1]
    logp = value_logp[:, 1:2]
    return value, action, logp, rnn_hidden_states


def init_params(key, obs_dim, hidden, dim_actions):
    k1, k2, k3 = jax.random.split(key, 3)
    # net linear
    w1 = jax.random.normal(k1, (obs_dim, hidden), jnp.float32) * 0.1
    b1 = jnp.zeros((1, hidden), jnp.float32)
    # CategoricalNet linear (habitat: orthogonal gain=0.01, bias=0)
    wa = jnp.linalg.qr(jax.random.normal(k2, (hidden, dim_actions), jnp.float32))[0] * 0.01
    ba = jnp.zeros((1, dim_actions), jnp.float32)
    # CriticHead: orthogonal weight, zero bias
    wc = jnp.linalg.qr(jax.random.normal(k3, (hidden, 1), jnp.float32))[0]
    bc = jnp.zeros((1, 1), jnp.float32)
    return (w1, b1, wa, ba, wc, bc)


def _reference(obs, params):
    w1, b1, wa, ba, wc, bc = params
    feat = jnp.maximum(obs @ w1 + b1, 0.0)
    logits = feat @ wa + ba
    value = feat @ wc + bc
    log_sm = jax.nn.log_softmax(logits, axis=-1)
    action = jnp.argmax(logits, axis=-1, keepdims=True)
    logp = jnp.take_along_axis(log_sm, action, axis=-1)
    return value, action.astype(jnp.int32), logp


if __name__ == "__main__":
    B, OBS, HID, ACT = 8, 32, 32, 4
    key = jax.random.PRNGKey(0)
    k_obs, k_par, k_rnn = jax.random.split(key, 3)

    obs = jax.random.normal(k_obs, (B, OBS), jnp.float32)
    rnn_hidden_states = jax.random.normal(k_rnn, (1, B, HID), jnp.float32)
    params = init_params(k_par, OBS, HID, ACT)

    value, action, logp, rnn_out = policy_act(obs, rnn_hidden_states, params)
    jax.block_until_ready((value, action, logp, rnn_out))

    v_ref, a_ref, lp_ref = _reference(obs, params)
    assert jnp.allclose(value, v_ref, atol=1e-5), "value mismatch"
    assert jnp.array_equal(action, a_ref), "action mismatch"
    assert jnp.allclose(logp, lp_ref, atol=1e-5), "log_prob mismatch"
    assert jnp.array_equal(rnn_out, rnn_hidden_states), "rnn passthrough mismatch"

    print("KERNEL_OK")
</pallas_src>

<mosaic_0001>
module attributes {stable_mosaic.version = 11 : i64} {
  func.func @_policy_act_kernel(%arg0: i32, %arg1: memref<8x32xf32, #tpu.memory_space<vmem>>, %arg2: memref<32x32xf32, #tpu.memory_space<vmem>>, %arg3: memref<1x32xf32, #tpu.memory_space<vmem>>, %arg4: memref<32x5xf32, #tpu.memory_space<vmem>>, %arg5: memref<1x5xf32, #tpu.memory_space<vmem>>, %arg6: memref<8x1xi32, #tpu.memory_space<vmem>>, %arg7: memref<8x2xf32, #tpu.memory_space<vmem>>) attributes {dimension_semantics = [#tpu.dimension_semantics<parallel>], iteration_bounds = array<i64: 1>, scalar_prefetch = 0 : i64, scratch_operands = 0 : i64, tpu.core_type = #tpu.core_type<tc>, window_params = [{transform_indices = @transform_0, window_bounds = array<i64: 8, 32>}, {pipeline_mode = #tpu.pipeline_mode<synchronous>, transform_indices = @transform_1, window_bounds = array<i64: 32, 32>}, {pipeline_mode = #tpu.pipeline_mode<synchronous>, transform_indices = @transform_2, window_bounds = array<i64: 1, 32>}, {pipeline_mode = #tpu.pipeline_mode<synchronous>, transform_indices = @transform_3, window_bounds = array<i64: 32, 5>}, {pipeline_mode = #tpu.pipeline_mode<synchronous>, transform_indices = @transform_4, window_bounds = array<i64: 1, 5>}, {transform_indices = @transform_5, window_bounds = array<i64: 8, 1>}, {transform_indices = @transform_6, window_bounds = array<i64: 8, 2>}]} {
    %c0 = arith.constant 0 : index
    %c0_0 = arith.constant 0 : index
    %0 = vector.load %arg1[%c0, %c0_0] : memref<8x32xf32, #tpu.memory_space<vmem>>, vector<8x32xf32>
    %c0_1 = arith.constant 0 : index
    %c0_2 = arith.constant 0 : index
    %1 = vector.load %arg2[%c0_1, %c0_2] : memref<32x32xf32, #tpu.memory_space<vmem>>, vector<32x32xf32>
    %cst = arith.constant dense<0.000000e+00> : vector<8x32xf32>
    %2 = tpu.matmul %0, %1, %cst {dimension_numbers = #tpu.dot_dimension_numbers<[1], [0], [0], [1], [0, 0, 1, 1], [], []>} : vector<8x32xf32>, vector<32x32xf32>, vector<8x32xf32> -> vector<8x32xf32>
    %c0_3 = arith.constant 0 : index
    %c0_4 = arith.constant 0 : index
    %3 = vector.load %arg3[%c0_3, %c0_4] : memref<1x32xf32, #tpu.memory_space<vmem>>, vector<1x32xf32>
    %4 = vector.broadcast %3 : vector<1x32xf32> to vector<8x32xf32>
    %5 = arith.addf %2, %4 : vector<8x32xf32>
    %cst_5 = arith.constant 0.000000e+00 : f32
    %6 = vector.broadcast %cst_5 : f32 to vector<8x32xf32>
    %7 = arith.maximumf %5, %6 : vector<8x32xf32>
    %c0_6 = arith.constant 0 : index
    %c0_7 = arith.constant 0 : index
    %8 = vector.load %arg4[%c0_6, %c0_7] : memref<32x5xf32, #tpu.memory_space<vmem>>, vector<32x5xf32>
    %cst_8 = arith.constant dense<0.000000e+00> : vector<8x5xf32>
    %9 = tpu.matmul %7, %8, %cst_8 {dimension_numbers = #tpu.dot_dimension_numbers<[1], [0], [0], [1], [0, 0, 1, 1], [], []>} : vector<8x32xf32>, vector<32x5xf32>, vector<8x5xf32> -> vector<8x5xf32>
    %c0_9 = arith.constant 0 : index
    %c0_10 = arith.constant 0 : index
    %10 = vector.load %arg5[%c0_9, %c0_10] : memref<1x5xf32, #tpu.memory_space<vmem>>, vector<1x5xf32>
    %11 = vector.broadcast %10 : vector<1x5xf32> to vector<8x5xf32>
    %12 = arith.addf %9, %11 : vector<8x5xf32>
    %13 = vector.extract_strided_slice %12 {offsets = [0, 0], sizes = [8, 4], strides = [1, 1]} : vector<8x5xf32> to vector<8x4xf32>
    %14 = vector.extract_strided_slice %12 {offsets = [0, 4], sizes = [8, 1], strides = [1, 1]} : vector<8x5xf32> to vector<8x1xf32>
    %cst_11 = arith.constant dense<0xFF800000> : vector<8xf32>
    %15 = vector.multi_reduction <maximumf>, %13, %cst_11 [1] : vector<8x4xf32> to vector<8xf32>
    %16 = vector.shape_cast %15 : vector<8xf32> to vector<8x1xf32>
    %17 = vector.broadcast %16 : vector<8x1xf32> to vector<8x4xf32>
    %18 = arith.subf %13, %17 : vector<8x4xf32>
    %19 = math.exp %18 : vector<8x4xf32>
    %cst_12 = arith.constant dense<0.000000e+00> : vector<8xf32>
    %20 = vector.multi_reduction <add>, %19, %cst_12 [1] : vector<8x4xf32> to vector<8xf32>
    %21 = vector.shape_cast %20 : vector<8xf32> to vector<8x1xf32>
    %22 = math.log %21 : vector<8x1xf32>
    %23 = tpu.iota {dimensions = array<i32: 1>} : vector<8x4xi32>
    %24 = vector.broadcast %16 : vector<8x1xf32> to vector<8x4xf32>
    %25 = arith.cmpf oge, %13, %24 : vector<8x4xf32>
    %c4_i32 = arith.constant 4 : i32
    %26 = vector.broadcast %c4_i32 : i32 to vector<8x4xi32>
    %27 = arith.select %25, %23, %26 : vector<8x4xi1>, vector<8x4xi32>
    %cst_13 = arith.constant dense<2147483647> : vector<8xi32>
    %28 = vector.multi_reduction <minsi>, %27, %cst_13 [1] : vector<8x4xi32> to vector<8xi32>
    %29 = vector.shape_cast %28 : vector<8xi32> to vector<8x1xi32>
    %c0_14 = arith.constant 0 : index
    %c0_15 = arith.constant 0 : index
    %30 = vector.load %arg6[%c0_14, %c0_15] : memref<8x1xi32, #tpu.memory_space<vmem>>, vector<8x1xi32>
    tpu.vector_store %arg6[%c0_14, %c0_15], %29 {strides = array<i32>} : memref<8x1xi32, #tpu.memory_space<vmem>>, vector<8x1xi32>,
    %cst_16 = arith.constant 0.000000e+00 : f32
    %31 = vector.broadcast %cst_16 : f32 to vector<8x1xf32>
    %32 = arith.subf %31, %22 : vector<8x1xf32>
    %33 = tpu.concatenate %14, %32 in 1 : vector<8x1xf32>, vector<8x1xf32> -> vector<8x2xf32>
    %c0_17 = arith.constant 0 : index
    %c0_18 = arith.constant 0 : index
    %34 = vector.load %arg7[%c0_17, %c0_18] : memref<8x2xf32, #tpu.memory_space<vmem>>, vector<8x2xf32>
    tpu.vector_store %arg7[%c0_17, %c0_18], %33 {strides = array<i32>} : memref<8x2xf32, #tpu.memory_space<vmem>>, vector<8x2xf32>,
    return
  }
  func.func @transform_0(%arg0: i32) -> (i32, i32) {
    %c0_i32 = arith.constant 0 : i32
    %c0_i32_0 = arith.constant 0 : i32
    return %arg0, %c0_i32 : i32, i32
  }
  func.func @transform_1(%arg0: i32) -> (i32, i32) {
    %c0_i32 = arith.constant 0 : i32
    %c0_i32_0 = arith.constant 0 : i32
    %c0_i32_1 = arith.constant 0 : i32
    return %c0_i32, %c0_i32_0 : i32, i32
  }
  func.func @transform_2(%arg0: i32) -> (i32, i32) {
    %c0_i32 = arith.constant 0 : i32
    %c0_i32_0 = arith.constant 0 : i32
    %c0_i32_1 = arith.constant 0 : i32
    return %c0_i32, %c0_i32_0 : i32, i32
  }
  func.func @transform_3(%arg0: i32) -> (i32, i32) {
    %c0_i32 = arith.constant 0 : i32
    %c0_i32_0 = arith.constant 0 : i32
    %c0_i32_1 = arith.constant 0 : i32
    return %c0_i32, %c0_i32_0 : i32, i32
  }
  func.func @transform_4(%arg0: i32) -> (i32, i32) {
    %c0_i32 = arith.constant 0 : i32
    %c0_i32_0 = arith.constant 0 : i32
    %c0_i32_1 = arith.constant 0 : i32
    return %c0_i32, %c0_i32_0 : i32, i32
  }
  func.func @transform_5(%arg0: i32) -> (i32, i32) {
    %c0_i32 = arith.constant 0 : i32
    %c0_i32_0 = arith.constant 0 : i32
    return %arg0, %c0_i32 : i32, i32
  }
  func.func @transform_6(%arg0: i32) -> (i32, i32) {
    %c0_i32 = arith.constant 0 : i32
    %c0_i32_0 = arith.constant 0 : i32
    return %arg0, %c0_i32 : i32, i32
  }
}

</mosaic_0001>

<bundles_post_ra>
// kernel: tpu_custom_call.1
= control target key start
LH: loop header
LB: loop body
LE: loop exit
PB: predicated region body
PF: predicated region fallthrough
CT: control target
= control target key end

     0   :  { %v285_v0 = vmov 0.0   ;;  %vm286_vm0 = vmmov 0   ;;  %vm34_vm1 = vcmask 261120   ;;  %vm193_vm2 = vcmask 31744   ;;  %s367_s1 = inlined_call_operand.vmem [shape: f32[32,32], index: 1, kind: input, shape index: {}]   ;;  %s368_s3 = inlined_call_operand.vmem [shape: f32[32,5], index: 3, kind: input, shape index: {}]   ;;  %s369_s0 = inlined_call_operand.vmem [shape: f32[8,32], index: 0, kind: input, shape index: {}]   ;;  %s370_s2 = inlined_call_operand.vmem [shape: f32[1,32], index: 2, kind: input, shape index: {}]   ;;  %s371_s4 = inlined_call_operand.vmem [shape: f32[1,5], index: 4, kind: input, shape index: {}]   ;;  %s372_s6 = inlined_call_operand.vmem [shape: f32[8,2], index: 6, kind: output, shape index: {1}]   ;;  %s373_s5 = inlined_call_operand.vmem [shape: s32[8,1], index: 5, kind: output, shape index: {0}]  }
   0x1   :  { %256 = vmatprep.subr.mxu0 %v285_v0  ;;  %v26_v1 = vld [vmem:[%s367_s1 + $0x18] sm:$0xff]  ;;  %v25_v2 = vld [vmem:[%s367_s1 + $0x10] sm:$0xff]  ;;  %264 = vmatprep.mubr.msk.f32.mxu0 %vm286_vm0, %v285_v0  ;;  %v24_v4 = vld [vmem:[%s367_s1 + $0x8] sm:$0xff]  ;;  %v205_v20 = vlaneseq  ;;  %vm224_vm5 = vcmask 7168   ;;  %vm232_vm6 = vcmask 15360  }
   0x2   :  { %257 = vmatpush3.msra.mxu0 %v26_v1  ;;  %267 = vmatprep.subr.mxu1 %v285_v0  ;;  %v112_v3 = vld [vmem:[%s368_s3 + $0x18] sm:$0xff]  ;;  %v23_v5 = vld [vmem:[%s367_s1] sm:$0xff]  ;;  %v111_v7 = vld [vmem:[%s368_s3 + $0x10] sm:$0xff] }
   0x3   :  { %258 = vmatprep.subr.mxu0 %v285_v0  ;;  %268 = vmatpush3.msra.mxu1 %v112_v3  ;;  %v22_v6 = vld [vmem:[%s369_s0] sm:$0xff]  ;;  %v110_v8 = vld [vmem:[%s368_s3 + $0x8] sm:$0xff]  ;;  %v206_v21 = vand.u32 127, %v205_v20 }
   0x4   :  { %259 = vmatpush3.msra.mxu0 %v25_v2  ;;  %269 = vmatprep.subr.mxu1 %v285_v0  ;;  %v109_v9 = vld [vmem:[%s368_s3] sm:$0xff] }
   0x5   :  { %260 = vmatprep.subr.mxu0 %v285_v0  ;;  %275 = vmatprep.mubr.msk.f32.mxu1 %vm286_vm0, %v285_v0  ;;  %v242_v10 = vld [vmem:[%s370_s2] ss:$0 sm:$0xff]  ;;  %s287_s2 = smov 124  }
   0x6   :  { %261 = vmatpush3.msra.mxu0 %v24_v4  ;;  %270 = vmatpush3.msra.mxu1 %v111_v7  ;;  %v244_v15 = vld [vmem:[%s371_s4] ss:$0 sm:$0xff] }
   0x7   :  { %262 = vmatprep.subr.mxu0 %v285_v0  ;;  %271 = vmatprep.subr.mxu1 %v285_v0 }
   0x8   :  { %263 = vmatpush3.msra.mxu0 %v23_v5  ;;  %272 = vmatpush3.msra.mxu1 %v110_v8 }
   0x9   :  { %265 = vmatmul.mubr.msk.f32.vlgmr.msra.gmra.mxu0 %vm34_vm1, %v22_v6  ;;  %273 = vmatprep.subr.mxu1 %v285_v0 }
   0xa   :  { %274 = vmatpush3.msra.mxu1 %v109_v9 }
  0xc9   :  { %v104_v11 = vpop.f32.mrf.mxu0 }
  0xca   :  { %v105_v12 = vadd.f32 %v242_v10, %v104_v11 }
  0xcb   :  { %v266_v13 = vpop.f32.mrf.mxu0 }
  0xcc   :  { %v108_v14 = vmax.f32 %v105_v12, 0.0 }
  0xce   :  { %276 = vmatmul.mubr.msk.f32.vlgmr.msra.gmra.mxu1 %vm34_vm1, %v108_v14 }
 0x18e   :  { %v189_v16 = vpop.f32.mrf.mxu1 }
 0x18f   :  { %v190_v17 = vadd.f32 %v244_v15, %v189_v16 }
 0x190   :  { %v277_v18 = vpop.f32.mrf.mxu1 }
 0x191   :  { %v194_v19 = vsel %vm193_vm2, %v190_v17, -inf }
 0x192   :  { %195 = vmax.xlane.f32.xlu0 %v194_v19 }
 0x21b   :  { %v196_v22 = vpop.xlane.xlu0 %195 }
 0x21c   :  { %v197_v23 = vsub.f32 %v190_v17, %v196_v22  ;;  %vm207_vm3 = vcmp.ge.f32.partialorder %v190_v17, %v196_v22 }
 0x21d   :  { %v208_v24 = vsel %vm207_vm3, %v206_v21, 4 }
 0x21e   :  { %v198_v25 = vmul.f32 1.442695, %v197_v23  ;;  %v209_v26 = vsel %vm193_vm2, %v208_v24, 2147483647 }
 0x21f   :  { %v211_v27 = vshra.s32 %v209_v26, 16  ;;  %v210_v31 = vand.u32 65535, %v209_v26 }
 0x220   :  { %281 = vpow2.f32 %v198_v25 }
 0x221   :  { %v213_v28 = vcvt.s32.f32 %v211_v27  ;;  %v212_v33 = vcvt.s32.f32 %v210_v31 }
 0x223   :  { %214 = vmin.xlane.f32.xlu0 %v213_v28 }
 0x22d   :  { %v282_v29 = vpop.eup %281 }
 0x22e   :  { %v200_v30 = vsel %vm193_vm2, %v282_v29, 0.0 }
 0x22f   :  { %201 = vadd.xlane.f32.xlu1 %v200_v30 }
 0x239   :  { %228 = vrot.lane.b32.xlu0 %v190_v17, %s287_s2 }
 0x2ac   :  { %v215_v32 = vpop.xlane.xlu0 %214 }
 0x2ad   :  { %vm216_vm4 = vcmp.eq.f32.partialorder %v213_v28, %v215_v32  ;;  %v221_v41 = vcvt.f32.s32 %v215_v32 }
 0x2ae   :  { %v217_v34 = vsel %vm216_vm4, %v212_v33, inf }
 0x2af   :  { %218 = vmin.xlane.f32.xlu1 %v217_v34  ;;  %v222_v43 = vshll.u32 %v221_v41, 16 }
 0x2b0   :  { %v229_v39 = vpop.permute.xlu0 %228 }
 0x2b8   :  { %v202_v35 = vpop.xlane.xlu1 %201 }
 0x2b9   :  { %283 = vlog2.f32 %v202_v35 }
 0x2c6   :  { %v284_v36 = vpop.eup %283 }
 0x2c7   :  { %v204_v37 = vmul.f32 0.6931472, %v284_v36 }
 0x2c9   :  { %v226_v38 = vsub.f32 0.0, %v204_v37 }
 0x2cb   :  { %v231_v40 = vsel %vm224_vm5, %v229_v39, %v226_v38 }
 0x2cc   :  { %233 = vst.msk [vmem:[%s372_s6] sm:$0xff] %vm232_vm6, %v231_v40 }
 0x338   :  { %v219_v42 = vpop.xlane.xlu1 %218 }
 0x339   :  { %v220_v44 = vcvt.f32.s32 %v219_v42 }
 0x33b   :  { %v223_v45 = vadd.s32 %v222_v43, %v220_v44 }
 0x33d   :  { %225 = vst.msk [vmem:[%s373_s5] sm:$0xff] %vm224_vm5, %v223_v45 }

</bundles_post_ra>
